<compile_context>
chip_gen: v7x
topology: tpu7x:2x2x1
jax: 0.10.0
libtpu: 0.0.40
codegen_flags: <defaults>
</compile_context>

<pallas_src>
import math
import functools

import numpy as np
import jax
import jax.numpy as jnp
from jax.experimental import pallas as pl
from jax.experimental.pallas import tpu as pltpu


def _timestep_embedder_kernel(t_ref, freqs2_ref, phase_ref,
                              w1_ref, b1_ref, w2_ref, b2_ref, out_ref,
                              *, silu_dtype):
    # t_ref:      (tn, 1)  f32
    # freqs2_ref: (1, F)   f32   [freqs | freqs] (+ zero-freq col if F odd)
    # phase_ref:  (1, F)   f32   [pi/2 ...     | 0 ...]
    # w1_ref:     (F, H)   mxu dtype    b1_ref: (1, H) f32
    # w2_ref:     (H, H)   mxu dtype    b2_ref: (1, H) f32
    # out_ref:    (tn, H)  out dtype
    args = t_ref[...] * freqs2_ref[...] + phase_ref[...]          # (tn, F) f32
    emb = jnp.sin(args)                                           # [cos | sin], no concat
    h = jnp.dot(emb.astype(w1_ref.dtype), w1_ref[...],
                preferred_element_type=jnp.float32) + b1_ref[...]
    # SiLU: x * sigmoid(x).  Clamp the exp argument (sigmoid saturates beyond
    # |30|) so we never feed inf to the approx reciprocal; the divide rides the
    # EUP slot.  On v6e/v7x the exp runs in bf16 (silu_dtype), on v5e in f32.
    e = jnp.exp(-jnp.clip(h, -30.0, 30.0).astype(silu_dtype)).astype(jnp.float32)
    h = h * pl.reciprocal(1.0 + e, approx=True)
    out = jnp.dot(h.astype(w2_ref.dtype), w2_ref[...],
                  preferred_element_type=jnp.float32) + b2_ref[...]
    out_ref[...] = out.astype(out_ref.dtype)


def _default_silu_dtype():
    """bf16 SiLU transcendentals only where the EUP/VPU have bf16 (v6e/v7x)."""
    try:
        kind = jax.devices()[0].device_kind.lower()
    except Exception:
        return jnp.float32
    return jnp.bfloat16 if ("v6" in kind or "v7" in kind) else jnp.float32


class TimestepEmbedder:
    """Pallas TPU TimestepEmbedder.  w1: (F, H), b1: (H,), w2: (H, H), b2: (H,)."""

    _VMEM_CAP = 48 << 20      # leave headroom under v7x's 64 MiB physical VMEM
    _VMEM_MARGIN = 4 << 20    # compiler-internal scratch headroom

    def __init__(self, w1, b1, w2, b2, frequency_embedding_size=256,
                 max_period=10000, *, out_dtype=jnp.float32,
                 mxu_dtype=jnp.bfloat16, row_tile=512, silu_dtype=None,
                 single_buffer_weights=True):
        F = int(frequency_embedding_size)
        H = int(w1.shape[1])
        assert w1.shape == (F, H) and w2.shape == (H, H)
        half = F // 2

        # --- hoisted, done once: freqs/phase tables and weight cast ----------
        # Phase trick: cos(x) = sin(x + pi/2); build [cos|sin] as one sin.
        freqs = jnp.exp(-math.log(max_period)
                        * jnp.arange(half, dtype=jnp.float32) / half)
        freqs2 = jnp.concatenate([freqs, freqs])
        phase = jnp.concatenate([jnp.full((half,), 0.5 * jnp.pi, jnp.float32),
                                 jnp.zeros((half,), jnp.float32)])
        if F % 2:   # torch zero-pads one column when dim is odd: sin(0*t+0)==0
            freqs2 = jnp.concatenate([freqs2, jnp.zeros((1,), jnp.float32)])
            phase = jnp.concatenate([phase, jnp.zeros((1,), jnp.float32)])
        self._freqs2 = freqs2.reshape(1, F)
        self._phase = phase.reshape(1, F)
        self._w1 = jnp.asarray(w1, mxu_dtype)
        self._w2 = jnp.asarray(w2, mxu_dtype)
        self._b1 = jnp.asarray(b1, jnp.float32).reshape(1, H)
        self._b2 = jnp.asarray(b2, jnp.float32).reshape(1, H)

        self.F, self.H = F, H
        self._out_dtype = out_dtype
        self._mxu_dtype = mxu_dtype
        self._row_tile = int(row_tile)
        self._silu_dtype = _default_silu_dtype() if silu_dtype is None else silu_dtype
        self._single_buffer_weights = bool(single_buffer_weights)
        self._cache = {}   # N -> compiled callable

    # ------------------------------------------------------------------ build
    def _variants(self):
        silu_opts = [self._silu_dtype]
        if np.dtype(self._silu_dtype) != np.dtype(jnp.float32):
            silu_opts.append(jnp.float32)
        buf_opts = [True, False] if self._single_buffer_weights else [False]
        # preferred config first; progressively safer fallbacks after
        return [(sb, sd) for sd in silu_opts for sb in buf_opts]

    def _build(self, N, single_buf, silu_dtype):
        F, H = self.F, self.H
        wbytes = np.dtype(self._mxu_dtype).itemsize
        obytes = np.dtype(self._out_dtype).itemsize
        kernel = functools.partial(_timestep_embedder_kernel, silu_dtype=silu_dtype)

        use_grid = N > self._row_tile
        if use_grid:
            def need(rt):
                wfac = 1 if single_buf else 2
                weights = (F * H + H * H) * wbytes * wfac
                small = (2 * F + 2 * H) * 4 * wfac
                t_tiles = rt * 4 * 2                 # double-buffered t tile
                out_tiles = rt * H * obytes * 2      # double-buffered out tile
                interm = rt * (F * 6 + H * 10)       # emb/h f32 + bf16 copies
                return weights + small + t_tiles + out_tiles + interm

            row_tile = self._row_tile
            while need(row_tile) + self._VMEM_MARGIN > self._VMEM_CAP and row_tile > 256:
                row_tile //= 2       # shrink the tile, never under-budget VMEM
            # TODO(synk): for H large enough that the resident HxH weight alone
            # exceeds the VMEM cap (~H>4k in bf16), a K-tiled second matmul
            # would be required; not needed for DiT-size hidden dims.
            vmem_need = need(row_tile)

            resident = dict(pipeline_mode=pl.Buffered(1)) if single_buf else {}
            in_specs = [
                pl.BlockSpec((row_tile, 1), lambda i: (i, 0)),           # t tile
                pl.BlockSpec((1, F), lambda i: (0, 0), **resident),      # freqs2
                pl.BlockSpec((1, F), lambda i: (0, 0), **resident),      # phase
                pl.BlockSpec((F, H), lambda i: (0, 0), **resident),      # w1
                pl.BlockSpec((1, H), lambda i: (0, 0), **resident),      # b1
                pl.BlockSpec((H, H), lambda i: (0, 0), **resident),      # w2
                pl.BlockSpec((1, H), lambda i: (0, 0), **resident),      # b2
            ]
            out_specs = pl.BlockSpec((row_tile, H), lambda i: (i, 0))
            grid = (pl.cdiv(N, row_tile),)
            # TODO(synk): pltpu.CORE_PARALLEL would shard rows across v7x's two
            # TensorCores; plain "parallel" kept for cross-generation safety.
            dim_sem = ("parallel",)
        else:
            # Small N: single invocation, full-array VMEM blocks (grid overhead
            # would dominate).
            vmem = pl.BlockSpec(memory_space=pltpu.MemorySpace.VMEM)
            in_specs = [vmem] * 7
            out_specs = vmem
            grid = None
            dim_sem = None
            vmem_need = ((F * H + H * H) * wbytes + (2 * F + 2 * H) * 4
                         + N * 4 + N * H * obytes + N * (F * 6 + H * 10))

        vmem_limit = int(min(max(vmem_need + self._VMEM_MARGIN, 32 << 20),
                             self._VMEM_CAP))

        cost = pl.CostEstimate(
            flops=2 * N * (F * H + H * H),
            transcendentals=N * (F + 2 * H),                 # sin + exp + rcp
            bytes_accessed=int(N * 4 + 2 * F * 4
                               + (F * H + H * H) * wbytes + 2 * H * 4
                               + N * H * obytes),
        )

        call_kwargs = dict(
            out_shape=jax.ShapeDtypeStruct((N, H), self._out_dtype),
            in_specs=in_specs,
            out_specs=out_specs,
            compiler_params=pltpu.CompilerParams(
                dimension_semantics=dim_sem, vmem_limit_bytes=vmem_limit),
            cost_estimate=cost,
        )
        if grid is not None:
            call_kwargs["grid"] = grid

        call = pl.pallas_call(kernel, **call_kwargs)

        def fn(t_col):
            return call(t_col, self._freqs2, self._phase,
                        self._w1, self._b1, self._w2, self._b2)
        return fn

    # ------------------------------------------------------------------- call
    def __call__(self, t):
        t_col = jnp.asarray(t, jnp.float32).reshape(-1, 1)
        N = t_col.shape[0]
        fn = self._cache.get(N)
        if fn is not None:
            return fn(t_col)
        last_err = None
        for single_buf, silu_dtype in self._variants():
            try:
                cand = self._build(N, single_buf, silu_dtype)
                out = jax.block_until_ready(cand(t_col))
            except Exception as err:     # e.g. Buffered(1)/bf16-exp unsupported
                last_err = err
                continue
            self._cache[N] = cand
            return out
        raise last_err


def _reference(t, w1, b1, w2, b2, frequency_embedding_size=256, max_period=10000):
    half = frequency_embedding_size // 2
    freqs = jnp.exp(-math.log(max_period)
                    * jnp.arange(half, dtype=jnp.float32) / half)
    args = t.astype(jnp.float32)[:, None] * freqs[None]
    emb = jnp.concatenate([jnp.cos(args), jnp.sin(args)], axis=-1)
    if frequency_embedding_size % 2:
        emb = jnp.concatenate([emb, jnp.zeros_like(emb[:, :1])], axis=-1)
    h = jax.nn.silu(emb @ w1 + b1)
    return h @ w2 + b2


if __name__ == "__main__":
    hidden = 32
    freq_dim = 256

    key = jax.random.PRNGKey(0)
    k_t, k_w1, k_b1, k_w2, k_b2 = jax.random.split(key, 5)

    # Deterministic synthetic parameters (nn.Linear weights stored as (in, out)).
    w1 = jax.random.normal(k_w1, (freq_dim, hidden), dtype=jnp.float32) * 0.02
    b1 = jax.random.normal(k_b1, (hidden,), dtype=jnp.float32) * 0.02
    w2 = jax.random.normal(k_w2, (hidden, hidden), dtype=jnp.float32) * 0.02
    b2 = jax.random.normal(k_b2, (hidden,), dtype=jnp.float32) * 0.02

    # Small batch, f32 output (torch semantics) -> no-grid full-VMEM path.
    embed_f32 = TimestepEmbedder(w1, b1, w2, b2, frequency_embedding_size=freq_dim,
                                 out_dtype=jnp.float32)
    N = 8
    t = jax.random.uniform(k_t, (N,), dtype=jnp.float32) * 1000.0
    out = jax.block_until_ready(embed_f32(t))
    ref = _reference(t, w1, b1, w2, b2, freq_dim)
    assert out.shape == (N, hidden) and out.dtype == jnp.float32
    # bf16 MXU operands + approx reciprocal -> looser tolerance than pure f32.
    assert jnp.allclose(out, ref, atol=1e-2, rtol=1e-2), "small-N mismatch vs reference"

    # Large batch (not a multiple of the 512-row tile), bf16 output (downstream
    # DiT activation dtype, halves writeback) -> gridded, parallel-over-rows
    # path with a masked partial last block (no batch padding, no post-slice).
    embed_bf16 = TimestepEmbedder(w1, b1, w2, b2, frequency_embedding_size=freq_dim,
                                  out_dtype=jnp.bfloat16)
    N2 = 1200
    t_big = jax.random.uniform(k_t, (N2,), dtype=jnp.float32) * 1000.0
    out2 = jax.block_until_ready(embed_bf16(t_big))
    ref2 = _reference(t_big, w1, b1, w2, b2, freq_dim)
    assert out2.shape == (N2, hidden) and out2.dtype == jnp.bfloat16
    assert jnp.allclose(out2.astype(jnp.float32), ref2, atol=2e-2, rtol=2e-2), \
        "gridded-N mismatch vs reference"

    print("KERNEL_OK")
</pallas_src>

<mosaic_0001>
module attributes {stable_mosaic.version = 11 : i64} {
  func.func @_timestep_embedder_kernel(%arg0: memref<8x1xf32, #tpu.memory_space<vmem>>, %arg1: memref<1x256xf32, #tpu.memory_space<vmem>>, %arg2: memref<1x256xf32, #tpu.memory_space<vmem>>, %arg3: memref<256x32xbf16, #tpu.memory_space<vmem>>, %arg4: memref<1x32xf32, #tpu.memory_space<vmem>>, %arg5: memref<32x32xbf16, #tpu.memory_space<vmem>>, %arg6: memref<1x32xf32, #tpu.memory_space<vmem>>, %arg7: memref<8x32xf32, #tpu.memory_space<vmem>>) attributes {dimension_semantics = [], scalar_prefetch = 0 : i64, scratch_operands = 0 : i64, tpu.core_type = #tpu.core_type<tc>} {
    %c0 = arith.constant 0 : index
    %c0_0 = arith.constant 0 : index
    %0 = vector.load %arg0[%c0, %c0_0] : memref<8x1xf32, #tpu.memory_space<vmem>>, vector<8x1xf32>
    %c0_1 = arith.constant 0 : index
    %c0_2 = arith.constant 0 : index
    %1 = vector.load %arg1[%c0_1, %c0_2] : memref<1x256xf32, #tpu.memory_space<vmem>>, vector<1x256xf32>
    %2 = vector.broadcast %0 : vector<8x1xf32> to vector<8x256xf32>
    %3 = vector.broadcast %1 : vector<1x256xf32> to vector<8x256xf32>
    %4 = arith.mulf %2, %3 : vector<8x256xf32>
    %c0_3 = arith.constant 0 : index
    %c0_4 = arith.constant 0 : index
    %5 = vector.load %arg2[%c0_3, %c0_4] : memref<1x256xf32, #tpu.memory_space<vmem>>, vector<1x256xf32>
    %6 = vector.broadcast %5 : vector<1x256xf32> to vector<8x256xf32>
    %7 = arith.addf %4, %6 : vector<8x256xf32>
    %8 = math.sin %7 : vector<8x256xf32>
    %9 = arith.truncf %8 : vector<8x256xf32> to vector<8x256xbf16>
    %c0_5 = arith.constant 0 : index
    %c0_6 = arith.constant 0 : index
    %10 = vector.load %arg3[%c0_5, %c0_6] : memref<256x32xbf16, #tpu.memory_space<vmem>>, vector<256x32xbf16>
    %cst = arith.constant dense<0.000000e+00> : vector<8x32xf32>
    %11 = tpu.matmul %9, %10, %cst {dimension_numbers = #tpu.dot_dimension_numbers<[1], [0], [0], [1], [0, 0, 1, 1], [], []>} : vector<8x256xbf16>, vector<256x32xbf16>, vector<8x32xf32> -> vector<8x32xf32>
    %c0_7 = arith.constant 0 : index
    %c0_8 = arith.constant 0 : index
    %12 = vector.load %arg4[%c0_7, %c0_8] : memref<1x32xf32, #tpu.memory_space<vmem>>, vector<1x32xf32>
    %13 = vector.broadcast %12 : vector<1x32xf32> to vector<8x32xf32>
    %14 = arith.addf %11, %13 : vector<8x32xf32>
    %cst_9 = arith.constant -3.000000e+01 : f32
    %cst_10 = arith.constant 3.000000e+01 : f32
    %15 = vector.broadcast %cst_9 : f32 to vector<8x32xf32>
    %16 = arith.maximumf %15, %14 : vector<8x32xf32>
    %17 = vector.broadcast %cst_10 : f32 to vector<8x32xf32>
    %18 = arith.minimumf %17, %16 : vector<8x32xf32>
    %cst_11 = arith.constant 0.000000e+00 : f32
    %19 = vector.broadcast %cst_11 : f32 to vector<8x32xf32>
    %20 = arith.subf %19, %18 : vector<8x32xf32>
    %21 = math.exp %20 : vector<8x32xf32>
    %cst_12 = arith.constant 1.000000e+00 : f32
    %22 = vector.broadcast %cst_12 : f32 to vector<8x32xf32>
    %23 = arith.addf %22, %21 : vector<8x32xf32>
    %24 = tpu.reciprocal %23 {approx = true} : vector<8x32xf32> -> vector<8x32xf32>
    %25 = arith.mulf %14, %24 : vector<8x32xf32>
    %26 = arith.truncf %25 : vector<8x32xf32> to vector<8x32xbf16>
    %c0_13 = arith.constant 0 : index
    %c0_14 = arith.constant 0 : index
    %27 = vector.load %arg5[%c0_13, %c0_14] : memref<32x32xbf16, #tpu.memory_space<vmem>>, vector<32x32xbf16>
    %cst_15 = arith.constant dense<0.000000e+00> : vector<8x32xf32>
    %28 = tpu.matmul %26, %27, %cst_15 {dimension_numbers = #tpu.dot_dimension_numbers<[1], [0], [0], [1], [0, 0, 1, 1], [], []>} : vector<8x32xbf16>, vector<32x32xbf16>, vector<8x32xf32> -> vector<8x32xf32>
    %c0_16 = arith.constant 0 : index
    %c0_17 = arith.constant 0 : index
    %29 = vector.load %arg6[%c0_16, %c0_17] : memref<1x32xf32, #tpu.memory_space<vmem>>, vector<1x32xf32>
    %30 = vector.broadcast %29 : vector<1x32xf32> to vector<8x32xf32>
    %31 = arith.addf %28, %30 : vector<8x32xf32>
    %c0_18 = arith.constant 0 : index
    %c0_19 = arith.constant 0 : index
    %32 = vector.load %arg7[%c0_18, %c0_19] : memref<8x32xf32, #tpu.memory_space<vmem>>, vector<8x32xf32>
    tpu.vector_store %arg7[%c0_18, %c0_19], %31 {strides = array<i32>} : memref<8x32xf32, #tpu.memory_space<vmem>>, vector<8x32xf32>,
    return
  }
}

module attributes {stable_mosaic.version = 11 : i64} {
  func.func @_timestep_embedder_kernel(%arg0: memref<8x1xf32, #tpu.memory_space<vmem>>, %arg1: memref<1x256xf32, #tpu.memory_space<vmem>>, %arg2: memref<1x256xf32, #tpu.memory_space<vmem>>, %arg3: memref<256x32xbf16, #tpu.memory_space<vmem>>, %arg4: memref<1x32xf32, #tpu.memory_space<vmem>>, %arg5: memref<32x32xbf16, #tpu.memory_space<vmem>>, %arg6: memref<1x32xf32, #tpu.memory_space<vmem>>, %arg7: memref<8x32xf32, #tpu.memory_space<vmem>>) attributes {dimension_semantics = [], scalar_prefetch = 0 : i64, scratch_operands = 0 : i64, tpu.core_type = #tpu.core_type<tc>} {
    %c0 = arith.constant 0 : index
    %c0_0 = arith.constant 0 : index
    %0 = vector.load %arg0[%c0, %c0_0] : memref<8x1xf32, #tpu.memory_space<vmem>>, vector<8x1xf32>
    %c0_1 = arith.constant 0 : index
    %c0_2 = arith.constant 0 : index
    %1 = vector.load %arg1[%c0_1, %c0_2] : memref<1x256xf32, #tpu.memory_space<vmem>>, vector<1x256xf32>
    %2 = vector.broadcast %0 : vector<8x1xf32> to vector<8x256xf32>
    %3 = vector.broadcast %1 : vector<1x256xf32> to vector<8x256xf32>
    %4 = arith.mulf %2, %3 : vector<8x256xf32>
    %c0_3 = arith.constant 0 : index
    %c0_4 = arith.constant 0 : index
    %5 = vector.load %arg2[%c0_3, %c0_4] : memref<1x256xf32, #tpu.memory_space<vmem>>, vector<1x256xf32>
    %6 = vector.broadcast %5 : vector<1x256xf32> to vector<8x256xf32>
    %7 = arith.addf %4, %6 : vector<8x256xf32>
    %8 = math.sin %7 : vector<8x256xf32>
    %9 = arith.truncf %8 : vector<8x256xf32> to vector<8x256xbf16>
    %c0_5 = arith.constant 0 : index
    %c0_6 = arith.constant 0 : index
    %10 = vector.load %arg3[%c0_5, %c0_6] : memref<256x32xbf16, #tpu.memory_space<vmem>>, vector<256x32xbf16>
    %cst = arith.constant dense<0.000000e+00> : vector<8x32xf32>
    %11 = tpu.matmul %9, %10, %cst {dimension_numbers = #tpu.dot_dimension_numbers<[1], [0], [0], [1], [0, 0, 1, 1], [], []>} : vector<8x256xbf16>, vector<256x32xbf16>, vector<8x32xf32> -> vector<8x32xf32>
    %c0_7 = arith.constant 0 : index
    %c0_8 = arith.constant 0 : index
    %12 = vector.load %arg4[%c0_7, %c0_8] : memref<1x32xf32, #tpu.memory_space<vmem>>, vector<1x32xf32>
    %13 = vector.broadcast %12 : vector<1x32xf32> to vector<8x32xf32>
    %14 = arith.addf %11, %13 : vector<8x32xf32>
    %cst_9 = arith.constant -3.000000e+01 : f32
    %cst_10 = arith.constant 3.000000e+01 : f32
    %15 = vector.broadcast %cst_9 : f32 to vector<8x32xf32>
    %16 = arith.maximumf %15, %14 : vector<8x32xf32>
    %17 = vector.broadcast %cst_10 : f32 to vector<8x32xf32>
    %18 = arith.minimumf %17, %16 : vector<8x32xf32>
    %cst_11 = arith.constant 0.000000e+00 : f32
    %19 = vector.broadcast %cst_11 : f32 to vector<8x32xf32>
    %20 = arith.subf %19, %18 : vector<8x32xf32>
    %21 = math.exp %20 : vector<8x32xf32>
    %cst_12 = arith.constant 1.000000e+00 : f32
    %22 = vector.broadcast %cst_12 : f32 to vector<8x32xf32>
    %23 = arith.addf %22, %21 : vector<8x32xf32>
    %24 = tpu.reciprocal %23 {approx = true} : vector<8x32xf32> -> vector<8x32xf32>
    %25 = arith.mulf %14, %24 : vector<8x32xf32>
    %26 = arith.truncf %25 : vector<8x32xf32> to vector<8x32xbf16>
    %c0_13 = arith.constant 0 : index
    %c0_14 = arith.constant 0 : index
    %27 = vector.load %arg5[%c0_13, %c0_14] : memref<32x32xbf16, #tpu.memory_space<vmem>>, vector<32x32xbf16>
    %cst_15 = arith.constant dense<0.000000e+00> : vector<8x32xf32>
    %28 = tpu.matmul %26, %27, %cst_15 {dimension_numbers = #tpu.dot_dimension_numbers<[1], [0], [0], [1], [0, 0, 1, 1], [], []>} : vector<8x32xbf16>, vector<32x32xbf16>, vector<8x32xf32> -> vector<8x32xf32>
    %c0_16 = arith.constant 0 : index
    %c0_17 = arith.constant 0 : index
    %29 = vector.load %arg6[%c0_16, %c0_17] : memref<1x32xf32, #tpu.memory_space<vmem>>, vector<1x32xf32>
    %30 = vector.broadcast %29 : vector<1x32xf32> to vector<8x32xf32>
    %31 = arith.addf %28, %30 : vector<8x32xf32>
    %c0_18 = arith.constant 0 : index
    %c0_19 = arith.constant 0 : index
    %32 = vector.load %arg7[%c0_18, %c0_19] : memref<8x32xf32, #tpu.memory_space<vmem>>, vector<8x32xf32>
    tpu.vector_store %arg7[%c0_18, %c0_19], %31 {strides = array<i32>} : memref<8x32xf32, #tpu.memory_space<vmem>>, vector<8x32xf32>,
    return
  }
}

</mosaic_0001>

<bundles_post_ra>
// kernel: tpu_custom_call.1
= control target key start
LH: loop header
LB: loop body
LE: loop exit
PB: predicated region body
PF: predicated region fallthrough
CT: control target
= control target key end

     0   :  { %v674_v1 = vmov 0   ;;  %s875_s0 = inlined_call_operand.vmem [shape: f32[8,1], index: 0, kind: input, shape index: {}]   ;;  %s876_s1 = inlined_call_operand.vmem [shape: f32[1,256], index: 1, kind: input, shape index: {}]   ;;  %s877_s2 = inlined_call_operand.vmem [shape: f32[1,256], index: 2, kind: input, shape index: {}]   ;;  %s878_s3 = inlined_call_operand.vmem [shape: bf16[256,32], index: 3, kind: input, shape index: {}]   ;;  %s879_s4 = inlined_call_operand.vmem [shape: f32[1,32], index: 4, kind: input, shape index: {}]   ;;  %s880_s5 = inlined_call_operand.vmem [shape: bf16[32,32], index: 5, kind: input, shape index: {}]   ;;  %s881_s6 = inlined_call_operand.vmem [shape: f32[1,32], index: 6, kind: input, shape index: {}]   ;;  %s882_s7 = inlined_call_operand.hbm [shape: f32[8,32], index: 7, kind: output, shape index: {}]  }
   0x1   :  { %v28_v0 = vld [vmem:[%s875_s0] sm:$0xff]  ;;  %619 = vset.pattern.permute.xlu0 %v674_v1 }
   0x2   :  { %32 = vperm.xlu0 %619, %v28_v0  }
   0x3   :  { %12 = vsyncpa [#allocation3], 0  ;;  %v620_v2 = vld [vmem:[%s878_s3 + $0x40] sm:$0xff]   ;;  %v622_v4 = vld [vmem:[%s878_s3 + $0x48] sm:$0xff]   ;;  %v36_v18 = vlaneseq  ;;  %v675_v53 = vmov 683565275  }
   0x4   :  { %v621_v3 = vld [vmem:[%s878_s3] sm:$0xff]   ;;  %568 = vmatprep.subr.bf16.mxu0 %v620_v2  ;;  %v623_v5 = vld [vmem:[%s878_s3 + $0x8] sm:$0xff]   ;;  %v624_v6 = vld [vmem:[%s878_s3 + $0x50] sm:$0xff]   ;;  %v676_v57 = vmov 2475754826  }
   0x5   :  { %569 = vmatpush3.bf16.msra.mxu0 %v621_v3  ;;  %v625_v7 = vld [vmem:[%s878_s3 + $0x10] sm:$0xff]   ;;  %v626_v8 = vld [vmem:[%s878_s3 + $0x58] sm:$0xff]   ;;  %v628_v10 = vld [vmem:[%s878_s3 + $0x60] sm:$0xff]   ;;  %v37_v19 = vshrl.u32 %v36_v18, 7  ;;  %v677_v59 = vmov 2131351028  }
   0x6   :  { %570 = vmatprep.subr.bf16.mxu0 %v622_v4  ;;  %v627_v9 = vld [vmem:[%s878_s3 + $0x18] sm:$0xff]   ;;  %v629_v11 = vld [vmem:[%s878_s3 + $0x20] sm:$0xff]   ;;  %v630_v12 = vld [vmem:[%s878_s3 + $0x68] sm:$0xff]   ;;  %v678_v61 = vmov 2102212464  }
   0x7   :  { %v631_v13 = vld [vmem:[%s878_s3 + $0x28] sm:$0xff]   ;;  %v632_v14 = vld [vmem:[%s878_s3 + $0x70] sm:$0xff]   ;;  %v634_v16 = vld [vmem:[%s878_s3 + $0x78] sm:$0xff]   ;;  %v38_v20 = vsub.s32 0, %v37_v19  ;;  %v42_v21 = vsub.s32 1, %v37_v19 }
   0x8   :  { %v633_v15 = vld [vmem:[%s878_s3 + $0x30] sm:$0xff]   ;;  %v635_v17 = vld [vmem:[%s878_s3 + $0x38] sm:$0xff]   ;;  %v29_v22 = vld [vmem:[%s876_s1] sm:$0x3]  ;;  %v679_v63 = vmov 920167782  }
   0x9   :  { %571 = vmatpush3.bf16.msra.mxu0 %v623_v5  ;;  %v48_v23 = vld [vmem:[%s877_s2] sm:$0x3]  ;;  %v39_v24 = vrot.slane %v29_v22, %v38_v20  ;;  %v43_v25 = vrot.slane %v29_v22, %v42_v21 }
   0xa   :  { %572 = vmatprep.subr.bf16.mxu0 %v624_v6  ;;  %v53_v26 = vrot.slane %v48_v23, %v38_v20  ;;  %v57_v27 = vrot.slane %v48_v23, %v42_v21  ;;  %v680_v6 = vmov 1326507024  }
   0xd   :  { %573 = vmatpush3.bf16.msra.mxu0 %v625_v7 }
   0xe   :  { %574 = vmatprep.subr.bf16.mxu0 %v626_v8 }
  0x11   :  { %575 = vmatpush3.bf16.msra.mxu0 %v627_v9 }
  0x12   :  { %576 = vmatprep.subr.bf16.mxu0 %v628_v10 }
  0x15   :  { %577 = vmatpush3.bf16.msra.mxu0 %v629_v11 }
  0x16   :  { %578 = vmatprep.subr.bf16.mxu0 %v630_v12 }
  0x19   :  { %579 = vmatpush3.bf16.msra.mxu0 %v631_v13 }
  0x1a   :  { %580 = vmatprep.subr.bf16.mxu0 %v632_v14 }
  0x1d   :  { %581 = vmatpush3.bf16.msra.mxu0 %v633_v15 }
  0x1e   :  { %582 = vmatprep.subr.bf16.mxu0 %v634_v16 }
  0x21   :  { %583 = vmatpush3.bf16.msra.mxu0 %v635_v17 }
  0x81   :  { %v33_v28 = vpop.permute.xlu0 %32 }
  0x82   :  { %v46_v29 = vmul.f32 %v39_v24, %v33_v28  ;;  %v47_v30 = vmul.f32 %v43_v25, %v33_v28 }
  0x84   :  { %v781_v31 = vadd.f32 %v53_v26, %v46_v29  ;;  %v783_v32 = vadd.f32 %v57_v27, %v47_v30 }
  0x86   :  { %v62_v33 = vand.u32 2147483647, %v781_v31  ;;  %v65_v34 = vand.u32 2139095040, %v781_v31  ;;  %v169_v35 = vand.u32 2139095040, %v783_v32  ;;  %v166_v39 = vand.u32 2147483647, %v783_v32 }
  0x87   :  { %vm64_vm14 = vcmp.lt.s32.totalorder %v781_v31, 0 }
  0x88   :  { %v66_v36 = vshrl.u32 %v65_v34, 23  ;;  %v170_v37 = vshrl.u32 %v169_v35, 23  ;;  %v69_v38 = vand.u32 8388607, %v62_v33  ;;  %v793_v45 = vand.u32 8388607, %v166_v39 }
  0x89   :  { %vm836_vm15 = vcmp.le.f32.partialorder %v62_v33, 0.7853982 }
  0x8a   :  { %v538_v40 = vadd.s32 4294967169, %v66_v36  ;;  %v542_v41 = vadd.s32 4294967169, %v170_v37  ;;  %v70_v44 = vor.u32 8388608, %v69_v38  ;;  %v174_v51 = vor.u32 8388608, %v793_v45 }
  0x8c   :  { %v72_v42 = vadd.s32 1, %v538_v40  ;;  %v176_v43 = vadd.s32 1, %v542_v41  ;;  %v795_v50 = vshll.u32 %v70_v44, 8  ;;  %v214_v45 = vshll.u32 %v174_v51, 8 }
  0x8e   :  { %vm73_vm0 = vcmp.gt.s32.totalorder %v72_v42, 0  ;;  %vm177_vm1 = vcmp.gt.s32.totalorder %v176_v43, 0 }
  0x8f   :  { %v74_v46 = vsel %vm73_vm0, %v72_v42, 0  ;;  %v178_v47 = vsel %vm177_vm1, %v176_v43, 0  ;;  %vm168_vm0 = vcmp.lt.s32.totalorder %v783_v32, 0  ;;  %vm167_vm1 = vcmp.le.f32.partialorder %v166_v39, 0.7853982 }
  0x90   :  { %v75_v48 = vshrl.u32 %v74_v46, 5  ;;  %v76_v49 = vand.u32 31, %v74_v46  ;;  %v798_v55 = vshrl.u32 %v178_v47, 5  ;;  %v180_v56 = vand.u32 31, %v178_v47 }
  0x92   :  { %v77_v52 = vsub.s32 32, %v76_v49  ;;  %v79_v54 = vshll.u32 %v675_v53, %v76_v49  ;;  %v82_v58 = vshll.u32 %v676_v57, %v76_v49  ;;  %v85_v60 = vshll.u32 %v677_v59, %v76_v49 }
  0x93   :  { %v88_v62 = vshll.u32 %v678_v61, %v76_v49  ;;  %v91_v0 = vshll.u32 %v679_v63, %v76_v49  ;;  %vm94_vm2 = vcmp.lt.s32.totalorder %v75_v48, 1  ;;  %vm95_vm3 = vcmp.lt.s32.totalorder %v75_v48, 2 }
  0x94   :  { %v80_v1 = vshrl.u32 %v676_v57, %v77_v52  ;;  %v83_v2 = vshrl.u32 %v677_v59, %v77_v52  ;;  %v86_v3 = vshrl.u32 %v678_v61, %v77_v52  ;;  %v78_v4 = vshrl.u32 %v675_v53, %v77_v52 }
  0x95   :  { %v89_v5 = vshrl.u32 %v679_v63, %v77_v52  ;;  %v92_v7 = vshrl.u32 %v680_v6, %v77_v52  ;;  %v181_v11 = vsub.s32 32, %v180_v56  ;;  %vm96_vm4 = vcmp.lt.s32.totalorder %v75_v48, 3 }
  0x96   :  { %v81_v8 = vor.u32 %v80_v1, %v79_v54  ;;  %v84_v9 = vor.u32 %v83_v2, %v82_v58  ;;  %v87_v10 = vor.u32 %v86_v3, %v85_v60  ;;  %vm97_vm5 = vcmp.lt.s32.totalorder %v75_v48, 4 }
  0x97   :  { %v90_v12 = vor.u32 %v89_v5, %v88_v62  ;;  %v93_v13 = vor.u32 %v92_v7, %v91_v0  ;;  %v183_v21 = vshll.u32 %v675_v53, %v180_v56  ;;  %v184_v24 = vshrl.u32 %v676_v57, %v181_v11 }
  0x98   :  { %v98_v14 = vsel %vm94_vm2, %v78_v4, %v81_v8  ;;  %v99_v15 = vsel %vm97_vm5, %v87_v10, 2102212464  ;;  %v102_v16 = vsel %vm94_vm2, %v81_v8, %v84_v9  ;;  %v106_v17 = vsel %vm94_vm2, %v84_v9, %v87_v10 }
  0x99   :  { %v100_v18 = vsel %vm96_vm4, %v84_v9, %v99_v15  ;;  %v103_v19 = vsel %vm97_vm5, %v90_v12, 920167782  ;;  %v107_v20 = vsel %vm97_vm5, %v93_v13, 1326507024  ;;  %v186_v25 = vshll.u32 %v676_v57, %v180_v56 }
  0x9a   :  { %v104_v22 = vsel %vm96_vm4, %v87_v10, %v103_v19  ;;  %v108_v23 = vsel %vm96_vm4, %v90_v12, %v107_v20  ;;  %v101_v26 = vsel %vm95_vm3, %v98_v14, %v100_v18  ;;  %v187_v29 = vshrl.u32 %v677_v59, %v181_v11 }
  0x9b   :  { %v105_v27 = vsel %vm95_vm3, %v102_v16, %v104_v22  ;;  %v109_v28 = vsel %vm95_vm3, %v106_v17, %v108_v23  ;;  %v185_v37 = vor.u32 %v184_v24, %v183_v21  ;;  %v189_v40 = vshll.u32 %v677_v59, %v180_v56 }
  0x9c   :  { %v807_v30 = vmul.u32.u64.low %v795_v50, %v109_v28  ;;  %v808_v34 = vmul.u32.u64.high %v795_v50, %v109_v28, %v807_v30  ;;  %v811_v35 = vmul.u32.u64.low %v795_v50, %v105_v27  ;;  %v812_v36 = vmul.u32.u64.high %v795_v50, %v105_v27, %v811_v35 }
  0x9d   :  { %v188_v38 = vor.u32 %v187_v29, %v186_v25  ;;  %v190_v41 = vshrl.u32 %v678_v61, %v181_v11  ;;  %v192_v42 = vshll.u32 %v678_v61, %v180_v56  ;;  %v193_v43 = vshrl.u32 %v679_v63, %v181_v11 }
  0x9e   :  { %v196_v44 = vshrl.u32 %v680_v6, %v181_v11  ;;  %v117_v46 = vmul.u32 %v795_v50, %v101_v26  ;;  %v182_v47 = vshrl.u32 %v675_v53, %v181_v11  ;;  %v195_v49 = vshll.u32 %v679_v63, %v180_v56 }
  0x9f   :  { %v191_v48 = vor.u32 %v190_v41, %v189_v40  ;;  %vm119_vm6 = vc.u32 %v808_v34, %v811_v35  ;;  %v120_v52 = vadd.s32 1, %v812_v36  ;;  %v194_v54 = vor.u32 %v193_v43, %v192_v42 }
  0xa0   :  { %vm198_vm7 = vcmp.lt.s32.totalorder %v798_v55, 1  ;;  %v197_v57 = vor.u32 %v196_v44, %v195_v49  ;;  %vm200_vm8 = vcmp.lt.s32.totalorder %v798_v55, 3  ;;  %vm201_vm9 = vcmp.lt.s32.totalorder %v798_v55, 4 }
  0xa1   :  { %v206_v58 = vsel %vm198_vm7, %v185_v37, %v188_v38  ;;  %v121_v51 = vsel %vm119_vm6, %v120_v52, %v812_v36  ;;  %v203_v59 = vsel %vm201_vm9, %v191_v48, 2102212464  ;;  %v207_v50 = vsel %vm201_vm9, %v194_v54, 920167782 }
  0xa2   :  { %v210_v53 = vsel %vm198_vm7, %v188_v38, %v191_v48  ;;  %v122_v60 = vadd.s32 %v121_v51, %v117_v46  ;;  %vm199_vm10 = vcmp.lt.s32.totalorder %v798_v55, 2  ;;  %v208_v56 = vsel %vm200_vm8, %v191_v48, %v207_v50 }
  0xa3   :  { %v211_v61 = vsel %vm201_vm9, %v197_v57, 1326507024  ;;  %v202_v62 = vsel %vm198_vm7, %v182_v47, %v185_v37  ;;  %v204_v63 = vsel %vm200_vm8, %v188_v38, %v203_v59  ;;  %v209_v0 = vsel %vm199_vm10, %v206_v58, %v208_v56 }
  0xa4   :  { %v212_v1 = vsel %vm200_vm8, %v194_v54, %v211_v61  ;;  %v123_v2 = vadd.s32 536870912, %v122_v60  ;;  %v822_v4 = vmul.u32.u64.low %v214_v45, %v209_v0  ;;  %v823_v5 = vmul.u32.u64.high %v214_v45, %v209_v0, %v822_v4 }
  0xa5   :  { %v213_v3 = vsel %vm199_vm10, %v210_v53, %v212_v1  ;;  %v205_v9 = vsel %vm199_vm10, %v202_v62, %v204_v63  ;;  %v118_v25 = vadd.s32 %v811_v35, %v808_v34  ;;  %vm154_vm6 = vweird.f32 %v781_v31 }
  0xa6   :  { %v825_v6 = vmul.u32.u64.low %v214_v45, %v213_v3  ;;  %v826_v7 = vmul.u32.u64.high %v214_v45, %v213_v3, %v825_v6  ;;  %v124_v8 = vshrl.u32 %v123_v2, 30  ;;  %v224_v11 = vadd.s32 1, %v823_v5 }
  0xa7   :  { %v221_v55 = vmul.u32 %v214_v45, %v205_v9  ;;  %vm258_vm9 = vweird.f32 %v783_v32  ;;  %vm682_vm10 = vmmov 0  }
  0xa8   :  { %v125_v10 = vshll.u32 %v124_v8, 30  ;;  %vm223_vm11 = vc.u32 %v826_v7, %v822_v4  ;;  %v222_v46 = vadd.s32 %v822_v4, %v826_v7  ;;  %v148_v51 = vsub.s32 4, %v124_v8 }
  0xa9   :  { %v225_v13 = vsel %vm223_vm11, %v224_v11, %v823_v5  ;;  %vm479_vm11 = vcmask 261120  }
  0xaa   :  { %v126_v12 = vsub.s32 %v122_v60, %v125_v10  ;;  %v226_v14 = vadd.s32 %v225_v13, %v221_v55  ;;  %v149_v62 = vsel %vm64_vm14, %v148_v51, %v124_v8 }
  0xab   :  { %v151_v1 = vsel %vm836_vm15, 0, %v149_v62 }
  0xac   :  { %v128_v15 = vsub.s32 0, %v126_v12  ;;  %v227_v16 = vadd.s32 536870912, %v226_v14  ;;  %v155_v4 = vadd.s32 3, %v151_v1 }
  0xae   :  { %v539_v17 = vmin.u32 %v128_v15, %v126_v12  ;;  %v228_v18 = vshrl.u32 %v227_v16, 30  ;;  %v156_v9 = vand.u32 3, %v155_v4 }
  0xb0   :  { %v130_v19 = vclz %v539_v17  ;;  %v229_v20 = vshll.u32 %v228_v18, 30  ;;  %v252_v0 = vsub.s32 4, %v228_v18  ;;  %vm158_vm2 = vcmp.eq.s32.totalorder %v156_v9, 0 }
  0xb1   :  { %vm161_vm3 = vcmp.eq.s32.totalorder %v156_v9, 2  ;;  %vm157_vm4 = vcmp.lt.s32.totalorder %v156_v9, 2 }
  0xb2   :  { %v540_v21 = vadd.s32 4294967294, %v130_v19  ;;  %v230_v22 = vsub.s32 %v226_v14, %v229_v20  ;;  %v253_v3 = vsel %vm168_vm0, %v252_v0, %v228_v18 }
  0xb3   :  { %v255_v7 = vsel %vm167_vm1, 0, %v253_v3 }
  0xb4   :  { %vm541_vm12 = vcmp.lt.s32.totalorder %v540_v21, 0  ;;  %v232_v24 = vsub.s32 0, %v230_v22  ;;  %v259_v55 = vadd.s32 3, %v255_v7 }
  0xb5   :  { %v133_v23 = vsel %vm541_vm12, 0, %v540_v21 }
  0xb6   :  { %v134_v26 = vsub.s32 32, %v133_v23  ;;  %v138_v27 = vsub.s32 4294967266, %v133_v23  ;;  %v543_v28 = vmin.u32 %v232_v24, %v230_v22  ;;  %v135_v29 = vshll.u32 %v126_v12, %v133_v23 }
  0xb7   :  { %v260_v14 = vand.u32 3, %v259_v55 }
  0xb8   :  { %v136_v30 = vshrl.u32 %v118_v25, %v134_v26  ;;  %v139_v36 = vadd.s32 127, %v138_v27  ;;  %v234_v37 = vclz %v543_v28  ;;  %v636_v26 = vld [vmem:[%s880_s5] sm:$0xff]   ;;  %v681_v27 = vmov 0.0  }
  0xb9   :  { %vm265_vm5 = vcmp.eq.s32.totalorder %v260_v14, 2  ;;  %vm262_vm7 = vcmp.eq.s32.totalorder %v260_v14, 0  ;;  %vm261_vm8 = vcmp.lt.s32.totalorder %v260_v14, 2  ;;  %593 = vmatprep.subr.bf16.mxu1 %v681_v27  ;;  %597 = vmatprep.mubr.msk.bf16.mxu1 %vm682_vm10, %v681_v27  ;;  %v546_v28 = vld [vmem:[%s879_s4] ss:$0 sm:$0xff]  ;;  %s683_s4 = smov [#allocation2]  }
  0xba   :  { %v137_v38 = vor.u32 %v136_v30, %v135_v29  ;;  %v140_v40 = vshll.u32 %v139_v36, 23  ;;  %v544_v41 = vadd.s32 4294967294, %v234_v37  ;;  %594 = vmatpush3.bf16.msra.mxu1 %v636_v26  ;;  %s530_s18 = sshll.u32 %s683_s4, 4  ;;  %s531_s18 = int_to_ptr.vmem [resolvable:$true] %s530_s18 }
  0xbb   :  { %595 = vmatprep.subr.bf16.mxu1 %v681_v27  ;;  %s650_s19 = scalar_lea.vmem %s531_s18, 128  ;;  %p655_p1 = scmp.lt.s32.totalorder %s531_s18, %s531_s18 }
  0xbc   :  { %v141_v42 = vor.u32 4788187, %v140_v40  ;;  %vm545_vm13 = vcmp.lt.s32.totalorder %v544_v41, 0  ;;  %v144_v44 = vcvt.s32.f32 %v137_v38  ;;  %p651_p0 = scmp.ne.s32.totalorder %s531_s18, %s650_s19  ;;  %p656_p2 = scmp.lt.s32.totalorder %s650_s19, %s650_s19 }
  0xbd   :  { %v237_v45 = vsel %vm545_vm13, 0, %v544_v41 }
  0xbe   :  { %v142_v43 = vand.u32 2147483647, %v141_v42  ;;  %v238_v47 = vsub.s32 32, %v237_v45  ;;  %v242_v48 = vsub.s32 4294967266, %v237_v45  ;;  %v239_v35 = vshll.u32 %v230_v22, %v237_v45  ;;  %p657_p3 = por %p656_p2, %p655_p1 }
  0xc0   :  { %v145_v34 = vmul.f32 %v144_v44, %v142_v43  ;;  %v240_v49 = vshrl.u32 %v222_v46, %v238_v47  ;;  %v243_v52 = vadd.s32 127, %v242_v48  ;;  %v564_v48 = vld [vmem:[%s881_s6] ss:$0 sm:$0xff]  ;;  %p658_p4 = pnand %p657_p3, %p651_p0 }
  0xc2   :  { %v146_v54 = vxor.u32 2147483648, %v145_v34  ;;  %v241_v57 = vor.u32 %v240_v49, %v239_v35  ;;  %v244_v58 = vshll.u32 %v243_v52, 23 }
  0xc4   :  { %v147_v59 = vsel %vm64_vm14, %v146_v54, %v145_v34  ;;  %v245_v53 = vor.u32 4788187, %v244_v58  ;;  %v248_v61 = vcvt.s32.f32 %v241_v57 }
  0xc5   :  { %v150_v60 = vsel %vm836_vm15, %v781_v31, %v147_v59  ;;  %v637_v31 = vld [vmem:[%s880_s5 + $0x8] sm:$0xff]  }
  0xc6   :  { %638 = vcosq.f32 %v150_v60  ;;  %v246_v56 = vand.u32 2147483647, %v245_v53  ;;  %596 = vmatpush3.bf16.msra.mxu1 %v637_v31 }
  0xc7   :  { %640 = vsinq.f32 %v150_v60 }
  0xc8   :  { %v249_v63 = vmul.f32 %v248_v61, %v246_v56 }
  0xca   :  { %v250_v2 = vxor.u32 2147483648, %v249_v63 }
  0xcc   :  { %v251_v33 = vsel %vm168_vm0, %v250_v2, %v249_v63 }
  0xcd   :  { %v254_v5 = vsel %vm167_vm1, %v783_v32, %v251_v33 }
  0xce   :  { %642 = vcosq.f32 %v254_v5 }
  0xcf   :  { %644 = vsinq.f32 %v254_v5 }
  0xd0   :  { %v639_v6 = vpop.eup %638 }
  0xd1   :  { %v641_v8 = vpop.eup %640  ;;  %v162_v11 = vxor.u32 2147483648, %v639_v6 }
  0xd2   :  { %v159_v10 = vxor.u32 2147483648, %v641_v8 }
  0xd3   :  { %v163_v13 = vsel %vm161_vm3, %v162_v11, %v641_v8 }
  0xd4   :  { %v160_v12 = vsel %vm158_vm2, %v639_v6, %v159_v10 }
  0xd5   :  { %v164_v15 = vsel %vm157_vm4, %v160_v12, %v163_v13 }
  0xd6   :  { %v165_v20 = vsel %vm154_vm6, nan, %v164_v15 }
  0xd7   :  { %v270_v24 = vpack.c.bf16 %v165_v20, %v165_v20 }
  0xd8   :  { %v643_v39 = vpop.eup %642 }
  0xd9   :  { %v645_v16 = vpop.eup %644  ;;  %v266_v17 = vxor.u32 2147483648, %v643_v39 }
  0xda   :  { %v263_v18 = vxor.u32 2147483648, %v645_v16 }
  0xdb   :  { %v267_v19 = vsel %vm265_vm5, %v266_v17, %v645_v16 }
  0xdc   :  { %v264_v21 = vsel %vm262_vm7, %v643_v39, %v263_v18 }
  0xdd   :  { %v268_v22 = vsel %vm261_vm8, %v264_v21, %v267_v19 }
  0xde   :  { %v269_v23 = vsel %vm258_vm9, nan, %v268_v22 }
  0xdf   :  { %v271_v25 = vpack.c.bf16 %v269_v23, %v269_v23 }
  0xe1   :  { %439 = vmatprep.mubr.bf16.mxu0 %v271_v25 }
  0xe2   :  { %440 = vmatmul.mubr.bf16.vlgmr.msra.gmra.mrb[0].mxu0 %v270_v24 }
 0x1b5   :  { %v584_v32 = vpop.f32.mrb[0].mxu0 }
 0x1b6   :  { %v585_v29 = vpop.f32.mrb[1].mxu0 }
 0x1b7   :  { %v586_v30 = vadd.f32 %v585_v29, %v584_v32  ;;  %v587_v36 = vpop.f32.mrb[2].mxu0 }
 0x1b8   :  { %v588_v37 = vpop.f32.mrb[3].mxu0 }
 0x1b9   :  { %v442_v38 = vadd.f32 %v586_v30, %v546_v28 }
 0x1bb   :  { %v563_v40 = vclamps-f32 %v442_v38, 30.0 }
 0x1bd   :  { %v449_v41 = vsub.f32 0.0, %v563_v40 }
 0x1bf   :  { %v450_v42 = vmul.f32 1.442695, %v449_v41 }
 0x1c1   :  { %646 = vpow2.f32 %v450_v42 }
 0x1cb   :  { %v647_v43 = vpop.eup %646 }
 0x1cc   :  { %v452_v44 = vadd.f32 1.0, %v647_v43 }
 0x1ce   :  { %648 = vrcp.f32 %v452_v44 }
 0x1d8   :  { %v649_v45 = vpop.eup %648 }
 0x1d9   :  { %v454_v46 = vmul.f32 %v649_v45, %v442_v38 }
 0x1db   :  { %v455_v47 = vpack.c.bf16 %v454_v46, %v454_v46 }
 0x1dd   :  { %598 = vmatmul.mubr.msk.bf16.vlgmr.msra.gmra.mrb[0].mxu1 %vm479_vm11, %v455_v47 }
 0x2b0   :  { %v517_v34 = vpop.f32.mrb[0].mxu1 }
 0x2b1   :  { %v518_v35 = vadd.f32 %v564_v48, %v517_v34  ;;  %v599_v49 = vpop.f32.mrb[1].mxu1 }
 0x2b2   :  { %v520_v52 = vpop.f32.mrb[2].mxu1 }
 0x2b3   :  { %523 = vst.msk [vmem:[#allocation2] sm:$0xff] %vm479_vm11, %v518_v35  ;;  %v600_v54 = vpop.f32.mrb[3].mxu1 }
 0x2b4   :  { %661 = shalt.err (!%p658_p4)
}
 0x2b5   :  { %s662_s6 = scalar_lea.hbm %s882_s7, 128 }
 0x2b6   :  { %p663_p5 = scmp.ne.s32.totalorder %s882_s7, %s662_s6  ;;  %p666_p6 = scmp.lt.u32.totalorder %s662_s6, %s882_s7 }
 0x2b8   :  { %p668_p7 = pnand %p666_p6, %p663_p5 }
 0x2ba   :  { %671 = shalt.err (!%p668_p7)
}
 0x2bb   :  { %533 = dma.vmem_to_hbm [thread:$0]  %s531_s18, 128, %s882_s7, [#allocation3]  }
 0x2bc   :  { %672 = dma.done.wait [#allocation3], 128  }
 0x2bd   :  { %673 = vsyncadd [#allocation3], 4294967168 }
 0x2be   :  { %537 = vsyncpa [#allocation3], 1 }

// kernel: tpu_custom_call.1
= control target key start
LH: loop header
LB: loop body
LE: loop exit
PB: predicated region body
PF: predicated region fallthrough
CT: control target
= control target key end

     0   :  { %v674_v1 = vmov 0   ;;  %s875_s0 = inlined_call_operand.vmem [shape: f32[8,1], index: 0, kind: input, shape index: {}]   ;;  %s876_s1 = inlined_call_operand.vmem [shape: f32[1,256], index: 1, kind: input, shape index: {}]   ;;  %s877_s2 = inlined_call_operand.vmem [shape: f32[1,256], index: 2, kind: input, shape index: {}]   ;;  %s878_s3 = inlined_call_operand.vmem [shape: bf16[256,32], index: 3, kind: input, shape index: {}]   ;;  %s879_s4 = inlined_call_operand.vmem [shape: f32[1,32], index: 4, kind: input, shape index: {}]   ;;  %s880_s5 = inlined_call_operand.vmem [shape: bf16[32,32], index: 5, kind: input, shape index: {}]   ;;  %s881_s6 = inlined_call_operand.vmem [shape: f32[1,32], index: 6, kind: input, shape index: {}]   ;;  %s882_s7 = inlined_call_operand.hbm [shape: f32[8,32], index: 7, kind: output, shape index: {}]  }
   0x1   :  { %v28_v0 = vld [vmem:[%s875_s0] sm:$0xff]  ;;  %619 = vset.pattern.permute.xlu0 %v674_v1 }
   0x2   :  { %32 = vperm.xlu0 %619, %v28_v0  }
   0x3   :  { %12 = vsyncpa [#allocation3], 0  ;;  %v620_v2 = vld [vmem:[%s878_s3 + $0x40] sm:$0xff]   ;;  %v622_v4 = vld [vmem:[%s878_s3 + $0x48] sm:$0xff]   ;;  %v36_v18 = vlaneseq  ;;  %v675_v53 = vmov 683565275  }
   0x4   :  { %v621_v3 = vld [vmem:[%s878_s3] sm:$0xff]   ;;  %568 = vmatprep.subr.bf16.mxu0 %v620_v2  ;;  %v623_v5 = vld [vmem:[%s878_s3 + $0x8] sm:$0xff]   ;;  %v624_v6 = vld [vmem:[%s878_s3 + $0x50] sm:$0xff]   ;;  %v676_v57 = vmov 2475754826  }
   0x5   :  { %569 = vmatpush3.bf16.msra.mxu0 %v621_v3  ;;  %v625_v7 = vld [vmem:[%s878_s3 + $0x10] sm:$0xff]   ;;  %v626_v8 = vld [vmem:[%s878_s3 + $0x58] sm:$0xff]   ;;  %v628_v10 = vld [vmem:[%s878_s3 + $0x60] sm:$0xff]   ;;  %v37_v19 = vshrl.u32 %v36_v18, 7  ;;  %v677_v59 = vmov 2131351028  }
   0x6   :  { %570 = vmatprep.subr.bf16.mxu0 %v622_v4  ;;  %v627_v9 = vld [vmem:[%s878_s3 + $0x18] sm:$0xff]   ;;  %v629_v11 = vld [vmem:[%s878_s3 + $0x20] sm:$0xff]   ;;  %v630_v12 = vld [vmem:[%s878_s3 + $0x68] sm:$0xff]   ;;  %v678_v61 = vmov 2102212464  }
   0x7   :  { %v631_v13 = vld [vmem:[%s878_s3 + $0x28] sm:$0xff]   ;;  %v632_v14 = vld [vmem:[%s878_s3 + $0x70] sm:$0xff]   ;;  %v634_v16 = vld [vmem:[%s878_s3 + $0x78] sm:$0xff]   ;;  %v38_v20 = vsub.s32 0, %v37_v19  ;;  %v42_v21 = vsub.s32 1, %v37_v19 }
   0x8   :  { %v633_v15 = vld [vmem:[%s878_s3 + $0x30] sm:$0xff]   ;;  %v635_v17 = vld [vmem:[%s878_s3 + $0x38] sm:$0xff]   ;;  %v29_v22 = vld [vmem:[%s876_s1] sm:$0x3]  ;;  %v679_v63 = vmov 920167782  }
   0x9   :  { %571 = vmatpush3.bf16.msra.mxu0 %v623_v5  ;;  %v48_v23 = vld [vmem:[%s877_s2] sm:$0x3]  ;;  %v39_v24 = vrot.slane %v29_v22, %v38_v20  ;;  %v43_v25 = vrot.slane %v29_v22, %v42_v21 }
   0xa   :  { %572 = vmatprep.subr.bf16.mxu0 %v624_v6  ;;  %v53_v26 = vrot.slane %v48_v23, %v38_v20  ;;  %v57_v27 = vrot.slane %v48_v23, %v42_v21  ;;  %v680_v6 = vmov 1326507024  }
   0xd   :  { %573 = vmatpush3.bf16.msra.mxu0 %v625_v7 }
   0xe   :  { %574 = vmatprep.subr.bf16.mxu0 %v626_v8 }
  0x11   :  { %575 = vmatpush3.bf16.msra.mxu0 %v627_v9 }
  0x12   :  { %576 = vmatprep.subr.bf16.mxu0 %v628_v10 }
  0x15   :  { %577 = vmatpush3.bf16.msra.mxu0 %v629_v11 }
  0x16   :  { %578 = vmatprep.subr.bf16.mxu0 %v630_v12 }
  0x19   :  { %579 = vmatpush3.bf16.msra.mxu0 %v631_v13 }
  0x1a   :  { %580 = vmatprep.subr.bf16.mxu0 %v632_v14 }
  0x1d   :  { %581 = vmatpush3.bf16.msra.mxu0 %v633_v15 }
  0x1e   :  { %582 = vmatprep.subr.bf16.mxu0 %v634_v16 }
  0x21   :  { %583 = vmatpush3.bf16.msra.mxu0 %v635_v17 }
  0x81   :  { %v33_v28 = vpop.permute.xlu0 %32 }
  0x82   :  { %v46_v29 = vmul.f32 %v39_v24, %v33_v28  ;;  %v47_v30 = vmul.f32 %v43_v25, %v33_v28 }
  0x84   :  { %v781_v31 = vadd.f32 %v53_v26, %v46_v29  ;;  %v783_v32 = vadd.f32 %v57_v27, %v47_v30 }
  0x86   :  { %v62_v33 = vand.u32 2147483647, %v781_v31  ;;  %v65_v34 = vand.u32 2139095040, %v781_v31  ;;  %v169_v35 = vand.u32 2139095040, %v783_v32  ;;  %v166_v39 = vand.u32 2147483647, %v783_v32 }
  0x87   :  { %vm64_vm14 = vcmp.lt.s32.totalorder %v781_v31, 0 }
  0x88   :  { %v66_v36 = vshrl.u32 %v65_v34, 23  ;;  %v170_v37 = vshrl.u32 %v169_v35, 23  ;;  %v69_v38 = vand.u32 8388607, %v62_v33  ;;  %v793_v45 = vand.u32 8388607, %v166_v39 }
  0x89   :  { %vm836_vm15 = vcmp.le.f32.partialorder %v62_v33, 0.7853982 }
  0x8a   :  { %v538_v40 = vadd.s32 4294967169, %v66_v36  ;;  %v542_v41 = vadd.s32 4294967169, %v170_v37  ;;  %v70_v44 = vor.u32 8388608, %v69_v38  ;;  %v174_v51 = vor.u32 8388608, %v793_v45 }
  0x8c   :  { %v72_v42 = vadd.s32 1, %v538_v40  ;;  %v176_v43 = vadd.s32 1, %v542_v41  ;;  %v795_v50 = vshll.u32 %v70_v44, 8  ;;  %v214_v45 = vshll.u32 %v174_v51, 8 }
  0x8e   :  { %vm73_vm0 = vcmp.gt.s32.totalorder %v72_v42, 0  ;;  %vm177_vm1 = vcmp.gt.s32.totalorder %v176_v43, 0 }
  0x8f   :  { %v74_v46 = vsel %vm73_vm0, %v72_v42, 0  ;;  %v178_v47 = vsel %vm177_vm1, %v176_v43, 0  ;;  %vm168_vm0 = vcmp.lt.s32.totalorder %v783_v32, 0  ;;  %vm167_vm1 = vcmp.le.f32.partialorder %v166_v39, 0.7853982 }
  0x90   :  { %v75_v48 = vshrl.u32 %v74_v46, 5  ;;  %v76_v49 = vand.u32 31, %v74_v46  ;;  %v798_v55 = vshrl.u32 %v178_v47, 5  ;;  %v180_v56 = vand.u32 31, %v178_v47 }
  0x92   :  { %v77_v52 = vsub.s32 32, %v76_v49  ;;  %v79_v54 = vshll.u32 %v675_v53, %v76_v49  ;;  %v82_v58 = vshll.u32 %v676_v57, %v76_v49  ;;  %v85_v60 = vshll.u32 %v677_v59, %v76_v49 }
  0x93   :  { %v88_v62 = vshll.u32 %v678_v61, %v76_v49  ;;  %v91_v0 = vshll.u32 %v679_v63, %v76_v49  ;;  %vm94_vm2 = vcmp.lt.s32.totalorder %v75_v48, 1  ;;  %vm95_vm3 = vcmp.lt.s32.totalorder %v75_v48, 2 }
  0x94   :  { %v80_v1 = vshrl.u32 %v676_v57, %v77_v52  ;;  %v83_v2 = vshrl.u32 %v677_v59, %v77_v52  ;;  %v86_v3 = vshrl.u32 %v678_v61, %v77_v52  ;;  %v78_v4 = vshrl.u32 %v675_v53, %v77_v52 }
  0x95   :  { %v89_v5 = vshrl.u32 %v679_v63, %v77_v52  ;;  %v92_v7 = vshrl.u32 %v680_v6, %v77_v52  ;;  %v181_v11 = vsub.s32 32, %v180_v56  ;;  %vm96_vm4 = vcmp.lt.s32.totalorder %v75_v48, 3 }
  0x96   :  { %v81_v8 = vor.u32 %v80_v1, %v79_v54  ;;  %v84_v9 = vor.u32 %v83_v2, %v82_v58  ;;  %v87_v10 = vor.u32 %v86_v3, %v85_v60  ;;  %vm97_vm5 = vcmp.lt.s32.totalorder %v75_v48, 4 }
  0x97   :  { %v90_v12 = vor.u32 %v89_v5, %v88_v62  ;;  %v93_v13 = vor.u32 %v92_v7, %v91_v0  ;;  %v183_v21 = vshll.u32 %v675_v53, %v180_v56  ;;  %v184_v24 = vshrl.u32 %v676_v57, %v181_v11 }
  0x98   :  { %v98_v14 = vsel %vm94_vm2, %v78_v4, %v81_v8  ;;  %v99_v15 = vsel %vm97_vm5, %v87_v10, 2102212464  ;;  %v102_v16 = vsel %vm94_vm2, %v81_v8, %v84_v9  ;;  %v106_v17 = vsel %vm94_vm2, %v84_v9, %v87_v10 }
  0x99   :  { %v100_v18 = vsel %vm96_vm4, %v84_v9, %v99_v15  ;;  %v103_v19 = vsel %vm97_vm5, %v90_v12, 920167782  ;;  %v107_v20 = vsel %vm97_vm5, %v93_v13, 1326507024  ;;  %v186_v25 = vshll.u32 %v676_v57, %v180_v56 }
  0x9a   :  { %v104_v22 = vsel %vm96_vm4, %v87_v10, %v103_v19  ;;  %v108_v23 = vsel %vm96_vm4, %v90_v12, %v107_v20  ;;  %v101_v26 = vsel %vm95_vm3, %v98_v14, %v100_v18  ;;  %v187_v29 = vshrl.u32 %v677_v59, %v181_v11 }
  0x9b   :  { %v105_v27 = vsel %vm95_vm3, %v102_v16, %v104_v22  ;;  %v109_v28 = vsel %vm95_vm3, %v106_v17, %v108_v23  ;;  %v185_v37 = vor.u32 %v184_v24, %v183_v21  ;;  %v189_v40 = vshll.u32 %v677_v59, %v180_v56 }
  0x9c   :  { %v807_v30 = vmul.u32.u64.low %v795_v50, %v109_v28  ;;  %v808_v34 = vmul.u32.u64.high %v795_v50, %v109_v28, %v807_v30  ;;  %v811_v35 = vmul.u32.u64.low %v795_v50, %v105_v27  ;;  %v812_v36 = vmul.u32.u64.high %v795_v50, %v105_v27, %v811_v35 }
  0x9d   :  { %v188_v38 = vor.u32 %v187_v29, %v186_v25  ;;  %v190_v41 = vshrl.u32 %v678_v61, %v181_v11  ;;  %v192_v42 = vshll.u32 %v678_v61, %v180_v56  ;;  %v193_v43 = vshrl.u32 %v679_v63, %v181_v11 }
  0x9e   :  { %v196_v44 = vshrl.u32 %v680_v6, %v181_v11  ;;  %v117_v46 = vmul.u32 %v795_v50, %v101_v26  ;;  %v182_v47 = vshrl.u32 %v675_v53, %v181_v11  ;;  %v195_v49 = vshll.u32 %v679_v63, %v180_v56 }
  0x9f   :  { %v191_v48 = vor.u32 %v190_v41, %v189_v40  ;;  %vm119_vm6 = vc.u32 %v808_v34, %v811_v35  ;;  %v120_v52 = vadd.s32 1, %v812_v36  ;;  %v194_v54 = vor.u32 %v193_v43, %v192_v42 }
  0xa0   :  { %vm198_vm7 = vcmp.lt.s32.totalorder %v798_v55, 1  ;;  %v197_v57 = vor.u32 %v196_v44, %v195_v49  ;;  %vm200_vm8 = vcmp.lt.s32.totalorder %v798_v55, 3  ;;  %vm201_vm9 = vcmp.lt.s32.totalorder %v798_v55, 4 }
  0xa1   :  { %v206_v58 = vsel %vm198_vm7, %v185_v37, %v188_v38  ;;  %v121_v51 = vsel %vm119_vm6, %v120_v52, %v812_v36  ;;  %v203_v59 = vsel %vm201_vm9, %v191_v48, 2102212464  ;;  %v207_v50 = vsel %vm201_vm9, %v194_v54, 920167782 }
  0xa2   :  { %v210_v53 = vsel %vm198_vm7, %v188_v38, %v191_v48  ;;  %v122_v60 = vadd.s32 %v121_v51, %v117_v46  ;;  %vm199_vm10 = vcmp.lt.s32.totalorder %v798_v55, 2  ;;  %v208_v56 = vsel %vm200_vm8, %v191_v48, %v207_v50 }
  0xa3   :  { %v211_v61 = vsel %vm201_vm9, %v197_v57, 1326507024  ;;  %v202_v62 = vsel %vm198_vm7, %v182_v47, %v185_v37  ;;  %v204_v63 = vsel %vm200_vm8, %v188_v38, %v203_v59  ;;  %v209_v0 = vsel %vm199_vm10, %v206_v58, %v208_v56 }
  0xa4   :  { %v212_v1 = vsel %vm200_vm8, %v194_v54, %v211_v61  ;;  %v123_v2 = vadd.s32 536870912, %v122_v60  ;;  %v822_v4 = vmul.u32.u64.low %v214_v45, %v209_v0  ;;  %v823_v5 = vmul.u32.u64.high %v214_v45, %v209_v0, %v822_v4 }
  0xa5   :  { %v213_v3 = vsel %vm199_vm10, %v210_v53, %v212_v1  ;;  %v205_v9 = vsel %vm199_vm10, %v202_v62, %v204_v63  ;;  %v118_v25 = vadd.s32 %v811_v35, %v808_v34  ;;  %vm154_vm6 = vweird.f32 %v781_v31 }
  0xa6   :  { %v825_v6 = vmul.u32.u64.low %v214_v45, %v213_v3  ;;  %v826_v7 = vmul.u32.u64.high %v214_v45, %v213_v3, %v825_v6  ;;  %v124_v8 = vshrl.u32 %v123_v2, 30  ;;  %v224_v11 = vadd.s32 1, %v823_v5 }
  0xa7   :  { %v221_v55 = vmul.u32 %v214_v45, %v205_v9  ;;  %vm258_vm9 = vweird.f32 %v783_v32  ;;  %vm682_vm10 = vmmov 0  }
  0xa8   :  { %v125_v10 = vshll.u32 %v124_v8, 30  ;;  %vm223_vm11 = vc.u32 %v826_v7, %v822_v4  ;;  %v222_v46 = vadd.s32 %v822_v4, %v826_v7  ;;  %v148_v51 = vsub.s32 4, %v124_v8 }
  0xa9   :  { %v225_v13 = vsel %vm223_vm11, %v224_v11, %v823_v5  ;;  %vm479_vm11 = vcmask 261120  }
  0xaa   :  { %v126_v12 = vsub.s32 %v122_v60, %v125_v10  ;;  %v226_v14 = vadd.s32 %v225_v13, %v221_v55  ;;  %v149_v62 = vsel %vm64_vm14, %v148_v51, %v124_v8 }
  0xab   :  { %v151_v1 = vsel %vm836_vm15, 0, %v149_v62 }
  0xac   :  { %v128_v15 = vsub.s32 0, %v126_v12  ;;  %v227_v16 = vadd.s32 536870912, %v226_v14  ;;  %v155_v4 = vadd.s32 3, %v151_v1 }
  0xae   :  { %v539_v17 = vmin.u32 %v128_v15, %v126_v12  ;;  %v228_v18 = vshrl.u32 %v227_v16, 30  ;;  %v156_v9 = vand.u32 3, %v155_v4 }
  0xb0   :  { %v130_v19 = vclz %v539_v17  ;;  %v229_v20 = vshll.u32 %v228_v18, 30  ;;  %v252_v0 = vsub.s32 4, %v228_v18  ;;  %vm158_vm2 = vcmp.eq.s32.totalorder %v156_v9, 0 }
  0xb1   :  { %vm161_vm3 = vcmp.eq.s32.totalorder %v156_v9, 2  ;;  %vm157_vm4 = vcmp.lt.s32.totalorder %v156_v9, 2 }
  0xb2   :  { %v540_v21 = vadd.s32 4294967294, %v130_v19  ;;  %v230_v22 = vsub.s32 %v226_v14, %v229_v20  ;;  %v253_v3 = vsel %vm168_vm0, %v252_v0, %v228_v18 }
  0xb3   :  { %v255_v7 = vsel %vm167_vm1, 0, %v253_v3 }
  0xb4   :  { %vm541_vm12 = vcmp.lt.s32.totalorder %v540_v21, 0  ;;  %v232_v24 = vsub.s32 0, %v230_v22  ;;  %v259_v55 = vadd.s32 3, %v255_v7 }
  0xb5   :  { %v133_v23 = vsel %vm541_vm12, 0, %v540_v21 }
  0xb6   :  { %v134_v26 = vsub.s32 32, %v133_v23  ;;  %v138_v27 = vsub.s32 4294967266, %v133_v23  ;;  %v543_v28 = vmin.u32 %v232_v24, %v230_v22  ;;  %v135_v29 = vshll.u32 %v126_v12, %v133_v23 }
  0xb7   :  { %v260_v14 = vand.u32 3, %v259_v55 }
  0xb8   :  { %v136_v30 = vshrl.u32 %v118_v25, %v134_v26  ;;  %v139_v36 = vadd.s32 127, %v138_v27  ;;  %v234_v37 = vclz %v543_v28  ;;  %v636_v26 = vld [vmem:[%s880_s5] sm:$0xff]   ;;  %v681_v27 = vmov 0.0  }
  0xb9   :  { %vm265_vm5 = vcmp.eq.s32.totalorder %v260_v14, 2  ;;  %vm262_vm7 = vcmp.eq.s32.totalorder %v260_v14, 0  ;;  %vm261_vm8 = vcmp.lt.s32.totalorder %v260_v14, 2  ;;  %593 = vmatprep.subr.bf16.mxu1 %v681_v27  ;;  %597 = vmatprep.mubr.msk.bf16.mxu1 %vm682_vm10, %v681_v27  ;;  %v546_v28 = vld [vmem:[%s879_s4] ss:$0 sm:$0xff]  ;;  %s683_s4 = smov [#allocation2]  }
  0xba   :  { %v137_v38 = vor.u32 %v136_v30, %v135_v29  ;;  %v140_v40 = vshll.u32 %v139_v36, 23  ;;  %v544_v41 = vadd.s32 4294967294, %v234_v37  ;;  %594 = vmatpush3.bf16.msra.mxu1 %v636_v26  ;;  %s530_s18 = sshll.u32 %s683_s4, 4  ;;  %s531_s18 = int_to_ptr.vmem [resolvable:$true] %s530_s18 }
  0xbb   :  { %595 = vmatprep.subr.bf16.mxu1 %v681_v27  ;;  %s650_s19 = scalar_lea.vmem %s531_s18, 128  ;;  %p655_p1 = scmp.lt.s32.totalorder %s531_s18, %s531_s18 }
  0xbc   :  { %v141_v42 = vor.u32 4788187, %v140_v40  ;;  %vm545_vm13 = vcmp.lt.s32.totalorder %v544_v41, 0  ;;  %v144_v44 = vcvt.s32.f32 %v137_v38  ;;  %p651_p0 = scmp.ne.s32.totalorder %s531_s18, %s650_s19  ;;  %p656_p2 = scmp.lt.s32.totalorder %s650_s19, %s650_s19 }
  0xbd   :  { %v237_v45 = vsel %vm545_vm13, 0, %v544_v41 }
  0xbe   :  { %v142_v43 = vand.u32 2147483647, %v141_v42  ;;  %v238_v47 = vsub.s32 32, %v237_v45  ;;  %v242_v48 = vsub.s32 4294967266, %v237_v45  ;;  %v239_v35 = vshll.u32 %v230_v22, %v237_v45  ;;  %p657_p3 = por %p656_p2, %p655_p1 }
  0xc0   :  { %v145_v34 = vmul.f32 %v144_v44, %v142_v43  ;;  %v240_v49 = vshrl.u32 %v222_v46, %v238_v47  ;;  %v243_v52 = vadd.s32 127, %v242_v48  ;;  %v564_v48 = vld [vmem:[%s881_s6] ss:$0 sm:$0xff]  ;;  %p658_p4 = pnand %p657_p3, %p651_p0 }
  0xc2   :  { %v146_v54 = vxor.u32 2147483648, %v145_v34  ;;  %v241_v57 = vor.u32 %v240_v49, %v239_v35  ;;  %v244_v58 = vshll.u32 %v243_v52, 23 }
  0xc4   :  { %v147_v59 = vsel %vm64_vm14, %v146_v54, %v145_v34  ;;  %v245_v53 = vor.u32 4788187, %v244_v58  ;;  %v248_v61 = vcvt.s32.f32 %v241_v57 }
  0xc5   :  { %v150_v60 = vsel %vm836_vm15, %v781_v31, %v147_v59  ;;  %v637_v31 = vld [vmem:[%s880_s5 + $0x8] sm:$0xff]  }
  0xc6   :  { %638 = vcosq.f32 %v150_v60  ;;  %v246_v56 = vand.u32 2147483647, %v245_v53  ;;  %596 = vmatpush3.bf16.msra.mxu1 %v637_v31 }
  0xc7   :  { %640 = vsinq.f32 %v150_v60 }
  0xc8   :  { %v249_v63 = vmul.f32 %v248_v61, %v246_v56 }
  0xca   :  { %v250_v2 = vxor.u32 2147483648, %v249_v63 }
  0xcc   :  { %v251_v33 = vsel %vm168_vm0, %v250_v2, %v249_v63 }
  0xcd   :  { %v254_v5 = vsel %vm167_vm1, %v783_v32, %v251_v33 }
  0xce   :  { %642 = vcosq.f32 %v254_v5 }
  0xcf   :  { %644 = vsinq.f32 %v254_v5 }
  0xd0   :  { %v639_v6 = vpop.eup %638 }
  0xd1   :  { %v641_v8 = vpop.eup %640  ;;  %v162_v11 = vxor.u32 2147483648, %v639_v6 }
  0xd2   :  { %v159_v10 = vxor.u32 2147483648, %v641_v8 }
  0xd3   :  { %v163_v13 = vsel %vm161_vm3, %v162_v11, %v641_v8 }
  0xd4   :  { %v160_v12 = vsel %vm158_vm2, %v639_v6, %v159_v10 }
  0xd5   :  { %v164_v15 = vsel %vm157_vm4, %v160_v12, %v163_v13 }
  0xd6   :  { %v165_v20 = vsel %vm154_vm6, nan, %v164_v15 }
  0xd7   :  { %v270_v24 = vpack.c.bf16 %v165_v20, %v165_v20 }
  0xd8   :  { %v643_v39 = vpop.eup %642 }
  0xd9   :  { %v645_v16 = vpop.eup %644  ;;  %v266_v17 = vxor.u32 2147483648, %v643_v39 }
  0xda   :  { %v263_v18 = vxor.u32 2147483648, %v645_v16 }
  0xdb   :  { %v267_v19 = vsel %vm265_vm5, %v266_v17, %v645_v16 }
  0xdc   :  { %v264_v21 = vsel %vm262_vm7, %v643_v39, %v263_v18 }
  0xdd   :  { %v268_v22 = vsel %vm261_vm8, %v264_v21, %v267_v19 }
  0xde   :  { %v269_v23 = vsel %vm258_vm9, nan, %v268_v22 }
  0xdf   :  { %v271_v25 = vpack.c.bf16 %v269_v23, %v269_v23 }
  0xe1   :  { %439 = vmatprep.mubr.bf16.mxu0 %v271_v25 }
  0xe2   :  { %440 = vmatmul.mubr.bf16.vlgmr.msra.gmra.mrb[0].mxu0 %v270_v24 }
 0x1b5   :  { %v584_v32 = vpop.f32.mrb[0].mxu0 }
 0x1b6   :  { %v585_v29 = vpop.f32.mrb[1].mxu0 }
 0x1b7   :  { %v586_v30 = vadd.f32 %v585_v29, %v584_v32  ;;  %v587_v36 = vpop.f32.mrb[2].mxu0 }
 0x1b8   :  { %v588_v37 = vpop.f32.mrb[3].mxu0 }
 0x1b9   :  { %v442_v38 = vadd.f32 %v586_v30, %v546_v28 }
 0x1bb   :  { %v563_v40 = vclamps-f32 %v442_v38, 30.0 }
 0x1bd   :  { %v449_v41 = vsub.f32 0.0, %v563_v40 }
 0x1bf   :  { %v450_v42 = vmul.f32 1.442695, %v449_v41 }
 0x1c1   :  { %646 = vpow2.f32 %v450_v42 }
 0x1cb   :  { %v647_v43 = vpop.eup %646 }
 0x1cc   :  { %v452_v44 = vadd.f32 1.0, %v647_v43 }
 0x1ce   :  { %648 = vrcp.f32 %v452_v44 }
 0x1d8   :  { %v649_v45 = vpop.eup %648 }
 0x1d9   :  { %v454_v46 = vmul.f32 %v649_v45, %v442_v38 }
 0x1db   :  { %v455_v47 = vpack.c.bf16 %v454_v46, %v454_v46 }
 0x1dd   :  { %598 = vmatmul.mubr.msk.bf16.vlgmr.msra.gmra.mrb[0].mxu1 %vm479_vm11, %v455_v47 }
 0x2b0   :  { %v517_v34 = vpop.f32.mrb[0].mxu1 }
 0x2b1   :  { %v518_v35 = vadd.f32 %v564_v48, %v517_v34  ;;  %v599_v49 = vpop.f32.mrb[1].mxu1 }
 0x2b2   :  { %v520_v52 = vpop.f32.mrb[2].mxu1 }
 0x2b3   :  { %523 = vst.msk [vmem:[#allocation2] sm:$0xff] %vm479_vm11, %v518_v35  ;;  %v600_v54 = vpop.f32.mrb[3].mxu1 }
 0x2b4   :  { %661 = shalt.err (!%p658_p4)
}
 0x2b5   :  { %s662_s6 = scalar_lea.hbm %s882_s7, 128 }
 0x2b6   :  { %p663_p5 = scmp.ne.s32.totalorder %s882_s7, %s662_s6  ;;  %p666_p6 = scmp.lt.u32.totalorder %s662_s6, %s882_s7 }
 0x2b8   :  { %p668_p7 = pnand %p666_p6, %p663_p5 }
 0x2ba   :  { %671 = shalt.err (!%p668_p7)
}
 0x2bb   :  { %533 = dma.vmem_to_hbm [thread:$0]  %s531_s18, 128, %s882_s7, [#allocation3]  }
 0x2bc   :  { %672 = dma.done.wait [#allocation3], 128  }
 0x2bd   :  { %673 = vsyncadd [#allocation3], 4294967168 }
 0x2be   :  { %537 = vsyncpa [#allocation3], 1 }

</bundles_post_ra>
